<compile_context>
chip_gen: v5e
topology: v5e:2x2
jax: 0.10.0
libtpu: 0.0.40
codegen_flags: <defaults>
</compile_context>

<pallas_src>
import math

import numpy as np
import jax
import jax.numpy as jnp
from jax.experimental import pallas as pl
from jax.experimental.pallas import tpu as pltpu

# ----------------------------------------------------------------------------
# Config (mirrors STFTFilter2(in_channels=C, n_fft=16, hop_length=8, 'tukey'))
# ----------------------------------------------------------------------------
B = 2                 # batch
C = 4                 # in_channels
L = 64                # sequence length
N_FFT = 16
HOP = 8
F = N_FFT // 2 + 1                 # one-sided frequency bins (frame_length)
T = (L - N_FFT) // HOP + 1         # STFT frames (center=False)
CF = C * F                         # flattened "(c f)" channel axis of the ECA
TF = T * F                         # 63
TF_PAD = ((TF + 127) // 128) * 128 # 128  (lane-dense spectrum block)
SPEC_W = 2 * TF_PAD                # 256  ([real | imag])
GATE_W = 2 * SPEC_W                # 512  ([A | B] gate tiles)

# ECA adaptive kernel size: channels = in_channels * frame_length, b=18, gamma=3
_ECA_B, _ECA_GAMMA = 18, 3
_t = int(abs((math.log2(CF) + _ECA_B) / _ECA_GAMMA))
K = _t if _t % 2 else _t + 1       # odd kernel size (=7)
PAD = K // 2                       # (=3), PAD < F required by the 3-shift trick


def _vmem():
    return pl.BlockSpec(memory_space=pltpu.MemorySpace.VMEM)


# ----------------------------------------------------------------------------
# The fused Pallas kernel
# ----------------------------------------------------------------------------
def _stft_eca_istft_kernel(x_ref, g8_ref, avg_ref, d_ref, u_ref, w_ref,
                           tile_ref, m8_ref, env_ref, out_ref):
    # x: (B*C, L)
    x = x_ref[...]

    # ---- STFT: framing + tukey window + one-sided rDFT folded into G8 -----
    # spec: (B*C, 256) = [real | imag], each half lane-padded T*F -> 128
    spec = jnp.dot(x, g8_ref[...], preferred_element_type=jnp.float32)

    # ---- complex global average pool over time (matmul with AVG) ----------
    y = jnp.dot(spec, avg_ref[...], preferred_element_type=jnp.float32)   # (B*C, 2F)

    # ---- neighbour channels (rows c-1 / c+1 within a batch, zero at edges)
    y_dn = jnp.dot(d_ref[...], y, preferred_element_type=jnp.float32)     # row r-1
    y_up = jnp.dot(u_ref[...], y, preferred_element_type=jnp.float32)     # row r+1

    # ---- complex 1-D conv over the flattened (c f) axis as Toeplitz dots --
    z = (jnp.dot(y,    w_ref[0], preferred_element_type=jnp.float32)
         + jnp.dot(y_dn, w_ref[1], preferred_element_type=jnp.float32)
         + jnp.dot(y_up, w_ref[2], preferred_element_type=jnp.float32))   # (B*C, 2F)

    # split sigmoid (applied independently to real / imaginary parts)
    g = jax.nn.sigmoid(z)                                                 # (B*C, 2F)

    # ---- broadcast the gate over the T frames with a 0/+-1 matmul ---------
    # gt = [A | Bm], A = [s_r | s_r], Bm = [-s_i | s_i]   (each (B*C, 256))
    gt = jnp.dot(g, tile_ref[...], preferred_element_type=jnp.float32)    # (B*C, 512)

    # ---- complex gating:  out = [sr*gr - si*gi | sr*gi + si*gr] ------------
    # roll by 128 lanes swaps the real/imag halves (pure vreg permutation).
    out = spec * gt[:, :SPEC_W] + pltpu.roll(spec, TF_PAD, 1) * gt[:, SPEC_W:]

    # ---- iSTFT: irfft + window + overlap-add folded into M8, then 1/env ---
    out_ref[...] = (jnp.dot(out, m8_ref[...], preferred_element_type=jnp.float32)
                    * env_ref[...])


def fused_forward_pallas(x2, p, w_conv):
    rows = x2.shape[0]
    return pl.pallas_call(
        _stft_eca_istft_kernel,
        out_shape=jax.ShapeDtypeStruct((rows, L), jnp.float32),
        in_specs=[_vmem()] * 9,
        out_specs=_vmem(),
    )(x2, p["G8"], p["AVG"], p["D"], p["U"], w_conv, p["TILE"], p["M8"],
      p["inv_env"])
    # TODO(synk): at larger B*C / L, add a row-tiled grid with
    # dimension_semantics=("parallel",) so v7x's two TensorCores both work.


# ----------------------------------------------------------------------------
# Parameter / constant construction (deterministic, in-script)
# ----------------------------------------------------------------------------
def _tukey_window(M, alpha=0.5):
    # scipy.signal.windows.tukey(M, alpha=0.5, sym=True)
    if alpha <= 0:
        return np.ones(M)
    n = np.arange(M, dtype=np.float64)
    width = int(np.floor(alpha * (M - 1) / 2.0))
    w = np.ones(M, dtype=np.float64)
    n1 = n[:width + 1]
    w[:width + 1] = 0.5 * (1 + np.cos(np.pi * (-1 + 2.0 * n1 / alpha / (M - 1))))
    n3 = n[M - width - 1:]
    w[M - width - 1:] = 0.5 * (1 + np.cos(np.pi * (-2.0 / alpha + 1 + 2.0 * n3 / alpha / (M - 1))))
    return w


def build_params(key):
    win = _tukey_window(N_FFT, alpha=0.5)

    nvec = np.arange(N_FFT)[:, None].astype(np.float64)
    fvec = np.arange(F)[None, :].astype(np.float64)
    ang = 2.0 * np.pi * nvec * fvec / N_FFT          # (N_FFT, F)
    cosm = np.cos(ang)
    sinm = np.sin(ang)

    # forward STFT matrices (framing + window + one-sided rDFT), column = t*F+f
    Gr = np.zeros((L, TF), dtype=np.float64)
    Gi = np.zeros((L, TF), dtype=np.float64)
    # inverse: irfft + window + overlap-add
    coef = np.full(F, 2.0)
    coef[0] = 1.0
    if N_FFT % 2 == 0:
        coef[-1] = 1.0
    Mr = np.zeros((TF, L), dtype=np.float64)
    Mi = np.zeros((TF, L), dtype=np.float64)
    env = np.zeros(L, dtype=np.float64)
    for t in range(T):
        for n in range(N_FFT):
            l = t * HOP + n
            if l >= L:
                continue
            Gr[l, t * F:(t + 1) * F] += win[n] * cosm[n]
            Gi[l, t * F:(t + 1) * F] += -win[n] * sinm[n]
            Mr[t * F:(t + 1) * F, l] = coef * cosm[n] * win[n] / N_FFT
            Mi[t * F:(t + 1) * F, l] = -coef * sinm[n] * win[n] / N_FFT
            env[l] += win[n] ** 2

    # TODO(synk): torch.istft raises on NOLA violations (tukey has zero
    # endpoints with center=False); here we clamp the envelope instead.
    inv_env = np.where(env > 1e-11, 1.0 / np.maximum(env, 1e-30), 0.0)

    # ---- merged / lane-padded constants for the fused kernel ---------------
    Gr_pad = np.zeros((L, TF_PAD)); Gr_pad[:, :TF] = Gr
    Gi_pad = np.zeros((L, TF_PAD)); Gi_pad[:, :TF] = Gi
    G8 = np.concatenate([Gr_pad, Gi_pad], axis=1)              # (L, 256)

    Mr_pad = np.zeros((TF_PAD, L)); Mr_pad[:TF, :] = Mr
    Mi_pad = np.zeros((TF_PAD, L)); Mi_pad[:TF, :] = Mi
    M8 = np.concatenate([Mr_pad, Mi_pad], axis=0)              # (256, L)

    # time-average pooling matrix: spec (.,256) @ AVG -> (., [re f | im f])
    AVG = np.zeros((SPEC_W, 2 * F))
    for t in range(T):
        for f in range(F):
            AVG[t * F + f, f] = 1.0 / T
            AVG[TF_PAD + t * F + f, F + f] = 1.0 / T

    # gate-tiling matrix: g (., 2F) @ TILE -> [s_r|s_r | -s_i|s_i] (., 512)
    TILE = np.zeros((2 * F, GATE_W))
    for t in range(T):
        for f in range(F):
            TILE[f, t * F + f] = 1.0
            TILE[f, TF_PAD + t * F + f] = 1.0
            TILE[F + f, SPEC_W + t * F + f] = -1.0
            TILE[F + f, SPEC_W + TF_PAD + t * F + f] = 1.0

    # neighbour-row selection matrices (zero across batch boundaries)
    R = B * C
    U = np.zeros((R, R)); D = np.zeros((R, R))
    for r in range(R):
        if (r % C) != C - 1:
            U[r, r + 1] = 1.0          # row r reads row r+1 (channel c+1)
        if (r % C) != 0:
            D[r, r - 1] = 1.0          # row r reads row r-1 (channel c-1)

    # banded-Toeplitz tap bases:  W[s] = sum_j wr[j]*BR[s,j] + wi[j]*BI[s,j]
    #   s=0: same channel, s=1: pairs with D (channel c-1), s=2: pairs with U
    BR = np.zeros((3, K, 2 * F, 2 * F))
    BI = np.zeros((3, K, 2 * F, 2 * F))
    koffs = [lambda j: PAD - j, lambda j: PAD - j - F, lambda j: F + PAD - j]
    for s in range(3):
        for j in range(K):
            E = np.eye(F, k=int(koffs[s](j)))
            BR[s, j, :F, :F] = E
            BR[s, j, F:, F:] = E
            BI[s, j, :F, F:] = E
            BI[s, j, F:, :F] = -E

    kr, ki = jax.random.split(key)
    wr = jax.random.normal(kr, (1, K), jnp.float32) / np.sqrt(K)
    wi = jax.random.normal(ki, (1, K), jnp.float32) / np.sqrt(K)

    return dict(
        # reference-path constants
        Gr=jnp.asarray(Gr, jnp.float32),
        Gi=jnp.asarray(Gi, jnp.float32),
        Mr=jnp.asarray(Mr, jnp.float32),
        Mi=jnp.asarray(Mi, jnp.float32),
        # fused-kernel constants
        G8=jnp.asarray(G8, jnp.float32),
        M8=jnp.asarray(M8, jnp.float32),
        AVG=jnp.asarray(AVG, jnp.float32),
        TILE=jnp.asarray(TILE, jnp.float32),
        U=jnp.asarray(U, jnp.float32),
        D=jnp.asarray(D, jnp.float32),
        BR=jnp.asarray(BR, jnp.float32),
        BI=jnp.asarray(BI, jnp.float32),
        inv_env=jnp.asarray(inv_env[None, :], jnp.float32),
        # ECA conv taps (parameters)
        wr=wr,
        wi=wi,
    )


# ----------------------------------------------------------------------------
# Full forward pass: one contiguous reshape + one fused Pallas kernel
# ----------------------------------------------------------------------------
def stft_filter2_forward(x, p):
    b, c, l = x.shape
    x2 = x.reshape(b * c, l)                                    # '(b c) l'
    # build the three banded conv matrices from the (traced) ECA taps — tiny.
    w_conv = (jnp.einsum('k,skij->sij', p["wr"][0], p["BR"])
              + jnp.einsum('k,skij->sij', p["wi"][0], p["BI"]))  # (3, 2F, 2F)
    y = fused_forward_pallas(x2, p, w_conv)                      # (B*C, L)
    return y.reshape(b, c, l)


# ----------------------------------------------------------------------------
# Pure-JAX reference (same math as the original module, no Pallas)
# ----------------------------------------------------------------------------
def reference_forward(x, p):
    b, c, l = x.shape
    x2 = x.reshape(b * c, l)
    sr = x2 @ p["Gr"]
    si = x2 @ p["Gi"]

    def to_btcf(s):
        return s.reshape(b, c, T, F).transpose(0, 2, 1, 3).reshape(b, T, c * F)

    xr, xi = to_btcf(sr), to_btcf(si)
    yr = xr.mean(axis=1)
    yi = xi.mean(axis=1)
    yrp = jnp.pad(yr, ((0, 0), (PAD, PAD)))
    yip = jnp.pad(yi, ((0, 0), (PAD, PAD)))
    zr = jnp.zeros_like(yr)
    zi = jnp.zeros_like(yi)
    wr = p["wr"][0]
    wi = p["wi"][0]
    for j in range(K):
        ar = yrp[:, j:j + CF]
        ai = yip[:, j:j + CF]
        zr = zr + wr[j] * ar - wi[j] * ai
        zi = zi + wr[j] * ai + wi[j] * ar
    sgr = jax.nn.sigmoid(zr)[:, None, :]
    sgi = jax.nn.sigmoid(zi)[:, None, :]
    gr = xr * sgr - xi * sgi
    gi = xr * sgi + xi * sgr

    def to_bctf(s):
        return s.reshape(b, T, c, F).transpose(0, 2, 1, 3).reshape(b * c, T * F)

    y = (to_bctf(gr) @ p["Mr"] + to_bctf(gi) @ p["Mi"]) * p["inv_env"]
    return y.reshape(b, c, l)


if __name__ == "__main__":
    key = jax.random.PRNGKey(0)
    k_x, k_w = jax.random.split(key)
    x = jax.random.normal(k_x, (B, C, L), dtype=jnp.float32)

    params = build_params(k_w)

    fwd = jax.jit(stft_filter2_forward)
    out = jax.block_until_ready(fwd(x, params))

    ref = reference_forward(x, params)
    assert out.shape == (B, C, L)
    assert np.all(np.isfinite(np.asarray(out)))
    np.testing.assert_allclose(np.asarray(out), np.asarray(ref),
                               rtol=1e-4, atol=1e-4)
    print("KERNEL_OK")
</pallas_src>

<mosaic_0001>
module attributes {stable_mosaic.version = 11 : i64} {
  func.func @_stft_eca_istft_kernel(%arg0: memref<8x64xf32, #tpu.memory_space<vmem>>, %arg1: memref<64x256xf32, #tpu.memory_space<vmem>>, %arg2: memref<256x18xf32, #tpu.memory_space<vmem>>, %arg3: memref<8x8xf32, #tpu.memory_space<vmem>>, %arg4: memref<8x8xf32, #tpu.memory_space<vmem>>, %arg5: memref<3x18x18xf32, #tpu.memory_space<vmem>>, %arg6: memref<18x512xf32, #tpu.memory_space<vmem>>, %arg7: memref<256x64xf32, #tpu.memory_space<vmem>>, %arg8: memref<1x64xf32, #tpu.memory_space<vmem>>, %arg9: memref<8x64xf32, #tpu.memory_space<vmem>>) attributes {dimension_semantics = [], scalar_prefetch = 0 : i64, scratch_operands = 0 : i64, tpu.core_type = #tpu.core_type<tc>} {
    %c0 = arith.constant 0 : index
    %c0_0 = arith.constant 0 : index
    %0 = vector.load %arg0[%c0, %c0_0] : memref<8x64xf32, #tpu.memory_space<vmem>>, vector<8x64xf32>
    %c0_1 = arith.constant 0 : index
    %c0_2 = arith.constant 0 : index
    %1 = vector.load %arg1[%c0_1, %c0_2] : memref<64x256xf32, #tpu.memory_space<vmem>>, vector<64x256xf32>
    %cst = arith.constant dense<0.000000e+00> : vector<8x256xf32>
    %2 = tpu.matmul %0, %1, %cst {dimension_numbers = #tpu.dot_dimension_numbers<[1], [0], [0], [1], [0, 0, 1, 1], [], []>} : vector<8x64xf32>, vector<64x256xf32>, vector<8x256xf32> -> vector<8x256xf32>
    %c0_3 = arith.constant 0 : index
    %c0_4 = arith.constant 0 : index
    %3 = vector.load %arg2[%c0_3, %c0_4] : memref<256x18xf32, #tpu.memory_space<vmem>>, vector<256x18xf32>
    %cst_5 = arith.constant dense<0.000000e+00> : vector<8x18xf32>
    %4 = tpu.matmul %2, %3, %cst_5 {dimension_numbers = #tpu.dot_dimension_numbers<[1], [0], [0], [1], [0, 0, 1, 1], [], []>} : vector<8x256xf32>, vector<256x18xf32>, vector<8x18xf32> -> vector<8x18xf32>
    %c0_6 = arith.constant 0 : index
    %c0_7 = arith.constant 0 : index
    %5 = vector.load %arg3[%c0_6, %c0_7] : memref<8x8xf32, #tpu.memory_space<vmem>>, vector<8x8xf32>
    %cst_8 = arith.constant dense<0.000000e+00> : vector<8x18xf32>
    %6 = tpu.matmul %5, %4, %cst_8 {dimension_numbers = #tpu.dot_dimension_numbers<[1], [0], [0], [1], [0, 0, 1, 1], [], []>} : vector<8x8xf32>, vector<8x18xf32>, vector<8x18xf32> -> vector<8x18xf32>
    %c0_9 = arith.constant 0 : index
    %c0_10 = arith.constant 0 : index
    %7 = vector.load %arg4[%c0_9, %c0_10] : memref<8x8xf32, #tpu.memory_space<vmem>>, vector<8x8xf32>
    %cst_11 = arith.constant dense<0.000000e+00> : vector<8x18xf32>
    %8 = tpu.matmul %7, %4, %cst_11 {dimension_numbers = #tpu.dot_dimension_numbers<[1], [0], [0], [1], [0, 0, 1, 1], [], []>} : vector<8x8xf32>, vector<8x18xf32>, vector<8x18xf32> -> vector<8x18xf32>
    %c0_12 = arith.constant 0 : index
    %c0_13 = arith.constant 0 : index
    %c0_14 = arith.constant 0 : index
    %9 = vector.load %arg5[%c0_12, %c0_13, %c0_14] : memref<3x18x18xf32, #tpu.memory_space<vmem>>, vector<1x18x18xf32>
    %10 = vector.shape_cast %9 : vector<1x18x18xf32> to vector<18x18xf32>
    %cst_15 = arith.constant dense<0.000000e+00> : vector<8x18xf32>
    %11 = tpu.matmul %4, %10, %cst_15 {dimension_numbers = #tpu.dot_dimension_numbers<[1], [0], [0], [1], [0, 0, 1, 1], [], []>} : vector<8x18xf32>, vector<18x18xf32>, vector<8x18xf32> -> vector<8x18xf32>
    %c1 = arith.constant 1 : index
    %c0_16 = arith.constant 0 : index
    %c0_17 = arith.constant 0 : index
    %12 = vector.load %arg5[%c1, %c0_16, %c0_17] : memref<3x18x18xf32, #tpu.memory_space<vmem>>, vector<1x18x18xf32>
    %13 = vector.shape_cast %12 : vector<1x18x18xf32> to vector<18x18xf32>
    %cst_18 = arith.constant dense<0.000000e+00> : vector<8x18xf32>
    %14 = tpu.matmul %6, %13, %cst_18 {dimension_numbers = #tpu.dot_dimension_numbers<[1], [0], [0], [1], [0, 0, 1, 1], [], []>} : vector<8x18xf32>, vector<18x18xf32>, vector<8x18xf32> -> vector<8x18xf32>
    %15 = arith.addf %11, %14 : vector<8x18xf32>
    %c2 = arith.constant 2 : index
    %c0_19 = arith.constant 0 : index
    %c0_20 = arith.constant 0 : index
    %16 = vector.load %arg5[%c2, %c0_19, %c0_20] : memref<3x18x18xf32, #tpu.memory_space<vmem>>, vector<1x18x18xf32>
    %17 = vector.shape_cast %16 : vector<1x18x18xf32> to vector<18x18xf32>
    %cst_21 = arith.constant dense<0.000000e+00> : vector<8x18xf32>
    %18 = tpu.matmul %8, %17, %cst_21 {dimension_numbers = #tpu.dot_dimension_numbers<[1], [0], [0], [1], [0, 0, 1, 1], [], []>} : vector<8x18xf32>, vector<18x18xf32>, vector<8x18xf32> -> vector<8x18xf32>
    %19 = arith.addf %15, %18 : vector<8x18xf32>
    %20 = arith.negf %19 : vector<8x18xf32>
    %21 = math.exp %20 : vector<8x18xf32>
    %cst_22 = arith.constant 1.000000e+00 : f32
    %22 = vector.broadcast %cst_22 : f32 to vector<8x18xf32>
    %23 = arith.addf %22, %21 : vector<8x18xf32>
    %24 = arith.divf %22, %23 : vector<8x18xf32>
    %c0_23 = arith.constant 0 : index
    %c0_24 = arith.constant 0 : index
    %25 = vector.load %arg6[%c0_23, %c0_24] : memref<18x512xf32, #tpu.memory_space<vmem>>, vector<18x512xf32>
    %cst_25 = arith.constant dense<0.000000e+00> : vector<8x512xf32>
    %26 = tpu.matmul %24, %25, %cst_25 {dimension_numbers = #tpu.dot_dimension_numbers<[1], [0], [0], [1], [0, 0, 1, 1], [], []>} : vector<8x18xf32>, vector<18x512xf32>, vector<8x512xf32> -> vector<8x512xf32>
    %27 = vector.extract_strided_slice %26 {offsets = [0, 0], sizes = [8, 256], strides = [1, 1]} : vector<8x512xf32> to vector<8x256xf32>
    %28 = arith.mulf %2, %27 : vector<8x256xf32>
    %c128_i32 = arith.constant 128 : i32
    %29 = tpu.dynamic_rotate %2 by %c128_i32 dim 1 : vector<8x256xf32>, i32 -> vector<8x256xf32>
    %30 = vector.extract_strided_slice %26 {offsets = [0, 256], sizes = [8, 256], strides = [1, 1]} : vector<8x512xf32> to vector<8x256xf32>
    %31 = arith.mulf %29, %30 : vector<8x256xf32>
    %32 = arith.addf %28, %31 : vector<8x256xf32>
    %c0_26 = arith.constant 0 : index
    %c0_27 = arith.constant 0 : index
    %33 = vector.load %arg7[%c0_26, %c0_27] : memref<256x64xf32, #tpu.memory_space<vmem>>, vector<256x64xf32>
    %cst_28 = arith.constant dense<0.000000e+00> : vector<8x64xf32>
    %34 = tpu.matmul %32, %33, %cst_28 {dimension_numbers = #tpu.dot_dimension_numbers<[1], [0], [0], [1], [0, 0, 1, 1], [], []>} : vector<8x256xf32>, vector<256x64xf32>, vector<8x64xf32> -> vector<8x64xf32>
    %c0_29 = arith.constant 0 : index
    %c0_30 = arith.constant 0 : index
    %35 = vector.load %arg8[%c0_29, %c0_30] : memref<1x64xf32, #tpu.memory_space<vmem>>, vector<1x64xf32>
    %36 = vector.broadcast %35 : vector<1x64xf32> to vector<8x64xf32>
    %37 = arith.mulf %34, %36 : vector<8x64xf32>
    %c0_31 = arith.constant 0 : index
    %c0_32 = arith.constant 0 : index
    %38 = vector.load %arg9[%c0_31, %c0_32] : memref<8x64xf32, #tpu.memory_space<vmem>>, vector<8x64xf32>
    tpu.vector_store %arg9[%c0_31, %c0_32], %37 {strides = array<i32>} : memref<8x64xf32, #tpu.memory_space<vmem>>, vector<8x64xf32>,
    return
  }
}

</mosaic_0001>

<bundles_post_ra>
// kernel: stft_filter2_forward.1
= control target key start
LH: loop header
LB: loop body
LE: loop exit
PB: predicated region body
PF: predicated region fallthrough
CT: control target
= control target key end

     0   :  { %vm50_vm0 = vcmask 523264   ;;  %s986_s0 = inlined_call_operand.vmem [shape: f32[8,64], index: 0, kind: input, shape index: {}]   ;;  %s987_s1 = inlined_call_operand.vmem [shape: f32[64,256], index: 1, kind: input, shape index: {}]   ;;  %s988_s2 = inlined_call_operand.vmem [shape: f32[256,18], index: 2, kind: input, shape index: {}]   ;;  %s989_s3 = inlined_call_operand.vmem [shape: f32[8,8], index: 3, kind: input, shape index: {}]   ;;  %s990_s4 = inlined_call_operand.vmem [shape: f32[8,8], index: 4, kind: input, shape index: {}]   ;;  %s991_s5 = inlined_call_operand.vmem [shape: f32[3,18,18], index: 5, kind: input, shape index: {}]   ;;  %s992_s6 = inlined_call_operand.vmem [shape: f32[18,512], index: 6, kind: input, shape index: {}]   ;;  %s993_s7 = inlined_call_operand.vmem [shape: f32[256,64], index: 7, kind: input, shape index: {}]   ;;  %s994_s8 = inlined_call_operand.vmem [shape: f32[1,64], index: 8, kind: input, shape index: {}]   ;;  %s995_s9 = inlined_call_operand.hbm [shape: f32[8,64], index: 9, kind: output, shape index: {}]  }
   0x1   :  { %v49_v0 = vld [vmem:[%s987_s1 + $0x78] sm:$0xff]  ;;  %v47_v1 = vld [vmem:[%s987_s1 + $0x68] sm:$0xff]  ;;  %v48_v2 = vld [vmem:[%s987_s1 + $0x70] sm:$0xff] }
   0x2   :  { %82 = vmatpush.msra.mxu3 %v49_v0  ;;  %v46_v3 = vld [vmem:[%s987_s1 + $0x60] sm:$0xff]  ;;  %v45_v4 = vld [vmem:[%s987_s1 + $0x58] sm:$0xff]  ;;  %62 = vmatpush.msra.mxu0 %v48_v2  ;;  %v44_v5 = vld [vmem:[%s987_s1 + $0x50] sm:$0xff] }
   0x3   :  { %v43_v6 = vld [vmem:[%s987_s1 + $0x48] sm:$0xff]  ;;  %v42_v7 = vld [vmem:[%s987_s1 + $0x40] sm:$0xff]  ;;  %v109_v8 = vld [vmem:[%s988_s2 + $0x78] sm:$0xff] }
   0x4   :  { %83 = vmatpush.msra.mxu3 %v47_v1  ;;  %63 = vmatpush.msra.mxu0 %v46_v3  ;;  %v41_v9 = vld [vmem:[%s987_s1 + $0x38] sm:$0xff]  ;;  %v108_v10 = vld [vmem:[%s988_s2 + $0x70] sm:$0xff]  ;;  %v107_v12 = vld [vmem:[%s988_s2 + $0x68] sm:$0xff] }
   0x5   :  { %126 = vmatpush.msra.mxu2 %v109_v8  ;;  %v40_v11 = vld [vmem:[%s987_s1 + $0x30] sm:$0xff]  ;;  %v39_v13 = vld [vmem:[%s987_s1 + $0x28] sm:$0xff]  ;;  %v38_v14 = vld [vmem:[%s987_s1 + $0x20] sm:$0xff] }
   0x6   :  { %84 = vmatpush.msra.mxu3 %v45_v4  ;;  %64 = vmatpush.msra.mxu0 %v44_v5  ;;  %v106_v15 = vld [vmem:[%s988_s2 + $0x60] sm:$0xff]  ;;  %v37_v16 = vld [vmem:[%s987_s1 + $0x18] sm:$0xff]  ;;  %v36_v17 = vld [vmem:[%s987_s1 + $0x10] sm:$0xff] }
   0x7   :  { %127 = vmatpush.msra.mxu2 %v108_v10  ;;  %v105_v18 = vld [vmem:[%s988_s2 + $0x58] sm:$0xff]  ;;  %v35_v19 = vld [vmem:[%s987_s1 + $0x8] sm:$0xff]  ;;  %v33_v20 = vld [vmem:[%s986_s0] sm:$0xff] }
   0x8   :  { %85 = vmatpush.msra.mxu3 %v43_v6  ;;  %65 = vmatpush.msra.mxu0 %v42_v7  ;;  %v34_v21 = vld [vmem:[%s987_s1] sm:$0xff]  ;;  %v125_v22 = vld [vmem:[%s988_s2 + $0xf8] sm:$0xff]  ;;  %v104_v23 = vld [vmem:[%s988_s2 + $0x50] sm:$0xff] }
   0x9   :  { %128 = vmatpush.msra.mxu2 %v107_v12  ;;  %v124_v24 = vld [vmem:[%s988_s2 + $0xf0] sm:$0xff] }
   0xa   :  { %86 = vmatpush.msra.mxu3 %v41_v9  ;;  %66 = vmatpush.msra.mxu0 %v40_v11 }
   0xb   :  { %129 = vmatpush.msra.mxu2 %v106_v15 }
   0xc   :  { %87 = vmatpush.msra.mxu3 %v39_v13  ;;  %67 = vmatpush.msra.mxu0 %v38_v14 }
   0xd   :  { %130 = vmatpush.msra.mxu2 %v105_v18 }
   0xe   :  { %88 = vmatpush.msra.mxu3 %v37_v16  ;;  %68 = vmatpush.msra.mxu0 %v36_v17 }
  0x10   :  { %89 = vmatpush.msra.mxu3 %v35_v19  ;;  %69 = vmatpush.msra.mxu0 %v34_v21 }
  0x11   :  { %534 = vmatmul.msk.f32.vlgmr.msra.gmra.mxu3 %vm50_vm0, %v33_v20 }
  0x12   :  { %14 = vsyncpa [#allocation3], 0  ;;  %533 = vmatmul.msk.f32.vlgmr.msra.gmra.mxu0 %vm50_vm0, %v33_v20  ;;  %146 = vmatpush.msrb.mxu3 %v125_v22  ;;  %v103_v25 = vld [vmem:[%s988_s2 + $0x48] sm:$0xff]  ;;  %v102_v27 = vld [vmem:[%s988_s2 + $0x40] sm:$0xff]  ;;  %vm167_vm1 = vcmask 64512   ;;  %vm226_vm2 = vcmask 1041408  }
  0x13   :  { %v123_v26 = vld [vmem:[%s988_s2 + $0xe8] sm:$0xff]  ;;  %131 = vmatpush.msra.mxu2 %v104_v23  ;;  %v122_v28 = vld [vmem:[%s988_s2 + $0xe0] sm:$0xff]  ;;  %v101_v29 = vld [vmem:[%s988_s2 + $0x38] sm:$0xff]  ;;  %vm222_vm3 = vcmask 146432   ;;  %s524_s20 = sshll.u32 %s995_s9, 4  ;;  %s525_s20 = int_to_ptr.hbm [resolvable:$true] %s524_s20 }
  0x14   :  { %147 = vmatpush.msrb.mxu3 %v124_v24  ;;  %v121_v30 = vld [vmem:[%s988_s2 + $0xd8] sm:$0xff]  ;;  %v100_v31 = vld [vmem:[%s988_s2 + $0x30] sm:$0xff]  ;;  %v99_v33 = vld [vmem:[%s988_s2 + $0x28] sm:$0xff] }
  0x15   :  { %132 = vmatpush.msra.mxu2 %v103_v25  ;;  %v120_v32 = vld [vmem:[%s988_s2 + $0xd0] sm:$0xff]  ;;  %v119_v34 = vld [vmem:[%s988_s2 + $0xc8] sm:$0xff]  ;;  %v98_v35 = vld [vmem:[%s988_s2 + $0x20] sm:$0xff] }
  0x16   :  { %148 = vmatpush.msrb.mxu3 %v123_v26  ;;  %v118_v36 = vld [vmem:[%s988_s2 + $0xc0] sm:$0xff]  ;;  %v97_v37 = vld [vmem:[%s988_s2 + $0x18] sm:$0xff]  ;;  %v96_v39 = vld [vmem:[%s988_s2 + $0x10] sm:$0xff] }
  0x17   :  { %133 = vmatpush.msra.mxu2 %v102_v27  ;;  %v117_v38 = vld [vmem:[%s988_s2 + $0xb8] sm:$0xff]  ;;  %v116_v40 = vld [vmem:[%s988_s2 + $0xb0] sm:$0xff]  ;;  %v95_v41 = vld [vmem:[%s988_s2 + $0x8] sm:$0xff] }
  0x18   :  { %149 = vmatpush.msrb.mxu3 %v122_v28  ;;  %v115_v42 = vld [vmem:[%s988_s2 + $0xa8] sm:$0xff]  ;;  %v114_v43 = vld [vmem:[%s988_s2 + $0xa0] sm:$0xff]  ;;  %v113_v44 = vld [vmem:[%s988_s2 + $0x98] sm:$0xff] }
  0x19   :  { %134 = vmatpush.msra.mxu2 %v101_v29  ;;  %v112_v45 = vld [vmem:[%s988_s2 + $0x90] sm:$0xff]  ;;  %v111_v46 = vld [vmem:[%s988_s2 + $0x88] sm:$0xff]  ;;  %v94_v47 = vld [vmem:[%s988_s2] sm:$0xff] }
  0x1a   :  { %150 = vmatpush.msrb.mxu3 %v121_v30  ;;  %v110_v48 = vld [vmem:[%s988_s2 + $0x80] sm:$0xff]  ;;  %v217_v56 = vld [vmem:[%s991_s5 + $0x10] sm:$0x3]  ;;  %v539_v57 = vld [vmem:[%s991_s5 + $0x28] sm:$0x3] }
  0x1b   :  { %135 = vmatpush.msra.mxu2 %v100_v31  ;;  %v166_v54 = vld [vmem:[%s989_s3] sm:$0xff]  ;;  %v216_v58 = vld [vmem:[%s991_s5 + $0x8] sm:$0xff]  ;;  %v537_v61 = vld [vmem:[%s991_s5 + $0x18] sm:$0xff] }
  0x1c   :  { %151 = vmatpush.msrb.mxu3 %v120_v32  ;;  %v191_v55 = vld [vmem:[%s990_s4] sm:$0xff]  ;;  %v545_v63 = vld [vmem:[%s991_s5 + $0x38] sm:$0xff]  ;;  %v544_v0 = vld [vmem:[%s991_s5 + $0x30] sm:$0xff] }
  0x1d   :  { %136 = vmatpush.msra.mxu2 %v99_v33  ;;  %v538_v59 = vld [vmem:[%s991_s5 + $0x20] sm:$0xff]  ;;  %v335_v4 = vld [vmem:[%s992_s6 + $0x48] sm:$0x3]  ;;  %v336_v5 = vld [vmem:[%s992_s6 + $0x50] sm:$0x3] }
  0x1e   :  { %152 = vmatpush.msrb.mxu3 %v119_v34  ;;  %v215_v60 = vld [vmem:[%s991_s5] sm:$0xff]  ;;  %v331_v8 = vld [vmem:[%s992_s6 + $0x28] sm:$0xff]  ;;  %v332_v9 = vld [vmem:[%s992_s6 + $0x30] sm:$0xff] }
  0x1f   :  { %137 = vmatpush.msra.mxu2 %v98_v35  ;;  %v546_v62 = vld [vmem:[%s991_s5 + $0x40] sm:$0x3]  ;;  %v327_v11 = vld [vmem:[%s992_s6 + $0x8] sm:$0xff]  ;;  %v328_v12 = vld [vmem:[%s992_s6 + $0x10] sm:$0xff] }
  0x20   :  { %153 = vmatpush.msrb.mxu3 %v118_v36  ;;  %v334_v3 = vld [vmem:[%s992_s6 + $0x40] sm:$0x3]  ;;  %v337_v16 = vld [vmem:[%s992_s6 + $0x58] sm:$0x3]  ;;  %v453_v22 = vld [vmem:[%s993_s7 + $0x70] sm:$0xff] }
  0x21   :  { %138 = vmatpush.msra.mxu2 %v97_v37  ;;  %v330_v7 = vld [vmem:[%s992_s6 + $0x20] sm:$0xff]  ;;  %v333_v17 = vld [vmem:[%s992_s6 + $0x38] sm:$0xff]  ;;  %v469_v24 = vld [vmem:[%s993_s7 + $0xf0] sm:$0xff] }
  0x22   :  { %154 = vmatpush.msrb.mxu3 %v117_v38  ;;  %v326_v10 = vld [vmem:[%s992_s6] sm:$0xff]  ;;  %v329_v19 = vld [vmem:[%s992_s6 + $0x18] sm:$0xff]  ;;  %v452_v25 = vld [vmem:[%s993_s7 + $0x68] sm:$0xff] }
  0x23   :  { %139 = vmatpush.msra.mxu2 %v96_v39  ;;  %v454_v21 = vld [vmem:[%s993_s7 + $0x78] sm:$0xff]  ;;  %v468_v26 = vld [vmem:[%s993_s7 + $0xe8] sm:$0xff]  ;;  %v451_v28 = vld [vmem:[%s993_s7 + $0x60] sm:$0xff] }
  0x24   :  { %155 = vmatpush.msrb.mxu3 %v116_v40  ;;  %v470_v23 = vld [vmem:[%s993_s7 + $0xf8] sm:$0xff]  ;;  %v467_v29 = vld [vmem:[%s993_s7 + $0xe0] sm:$0xff]  ;;  %v449_v33 = vld [vmem:[%s993_s7 + $0x50] sm:$0xff] }
  0x25   :  { %140 = vmatpush.msra.mxu2 %v95_v41  ;;  %v450_v31 = vld [vmem:[%s993_s7 + $0x58] sm:$0xff]  ;;  %v465_v34 = vld [vmem:[%s993_s7 + $0xd0] sm:$0xff]  ;;  %v448_v35 = vld [vmem:[%s993_s7 + $0x48] sm:$0xff] }
  0x26   :  { %156 = vmatpush.msrb.mxu3 %v115_v42  ;;  %v466_v32 = vld [vmem:[%s993_s7 + $0xd8] sm:$0xff]  ;;  %v464_v36 = vld [vmem:[%s993_s7 + $0xc8] sm:$0xff]  ;;  %v447_v37 = vld [vmem:[%s993_s7 + $0x40] sm:$0xff] }
  0x27   :  { %141 = vmatpush.msra.mxu2 %v94_v47  ;;  %v463_v38 = vld [vmem:[%s993_s7 + $0xc0] sm:$0xff]  ;;  %v446_v41 = vld [vmem:[%s993_s7 + $0x38] sm:$0xff] }
  0x28   :  { %157 = vmatpush.msrb.mxu3 %v114_v43  ;;  %v462_v42 = vld [vmem:[%s993_s7 + $0xb8] sm:$0xff] }
  0x29   :  { %491 = vmatpush.msrb.mxu2 %v470_v23 }
  0x2a   :  { %158 = vmatpush.msrb.mxu3 %v113_v44  ;;  %v445_v44 = vld [vmem:[%s993_s7 + $0x30] sm:$0xff] }
  0x2b   :  { %492 = vmatpush.msrb.mxu2 %v469_v24 }
  0x2c   :  { %159 = vmatpush.msrb.mxu3 %v112_v45 }
  0x2d   :  { %493 = vmatpush.msrb.mxu2 %v468_v26 }
  0x2e   :  { %160 = vmatpush.msrb.mxu3 %v111_v46 }
  0x2f   :  { %494 = vmatpush.msrb.mxu2 %v467_v29 }
  0x30   :  { %161 = vmatpush.msrb.mxu3 %v110_v48 }
  0x31   :  { %495 = vmatpush.msrb.mxu2 %v466_v32 }
  0x32   :  { %554 = vmatpush.msk.msra.mxu3 %vm226_vm2, %v336_v5 }
  0x33   :  { %496 = vmatpush.msrb.mxu2 %v465_v34 }
  0x34   :  { %407 = vmatpush.msra.mxu3 %v332_v9 }
  0x35   :  { %497 = vmatpush.msrb.mxu2 %v464_v36 }
  0x36   :  { %408 = vmatpush.msra.mxu3 %v328_v12 }
  0x37   :  { %498 = vmatpush.msrb.mxu2 %v463_v38 }
  0x39   :  { %499 = vmatpush.msrb.mxu2 %v462_v42 }
  0x8f   :  { %v790_v49 = vpop.f32.mrf.mxu0 }
  0x90   :  { %142 = vmatmul.f32.vlgmr.msra.gmra.mxu2 %v790_v49 }
  0x94   :  { %v793_v50 = vpop.f32.mrf.mxu3 }
  0x95   :  { %162 = vmatmul.f32.vlgmr.msrb.gmra.mxu3 %v793_v50 }
 0x113   :  { %v143_v51 = vpop.f32.mrf.mxu2 }
 0x118   :  { %v163_v52 = vpop.f32.mrf.mxu3 }
 0x119   :  { %v164_v53 = vadd.f32 %v163_v52, %v143_v51 }
 0x11b   :  { %186 = vmatpush.msrb.mxu0 %v164_v53  ;;  %210 = vmatpush.msra.mxu1 %v164_v53 }
 0x11c   :  { %535 = vmatmul.msk.f32.vlgmr.msrb.gmra.mxu0 %vm167_vm1, %v166_v54  ;;  %536 = vmatmul.msk.f32.vlgmr.msra.gmra.mxu1 %vm167_vm1, %v191_v55  ;;  %v444_v54 = vld [vmem:[%s993_s7 + $0x28] sm:$0xff]  ;;  %v461_v55 = vld [vmem:[%s993_s7 + $0xb0] sm:$0xff] }
 0x11d   :  { %542 = vmatpush.msk.msrb.mxu1 %vm226_vm2, %v217_v56  ;;  %540 = vmatpush.msk.msra.mxu0 %vm226_vm2, %v539_v57  ;;  %v443_v56 = vld [vmem:[%s993_s7 + $0x20] sm:$0xff]  ;;  %v460_v57 = vld [vmem:[%s993_s7 + $0xa8] sm:$0xff] }
 0x11e   :  { %500 = vmatpush.msrb.mxu2 %v461_v55 }
 0x11f   :  { %270 = vmatpush.msrb.mxu1 %v216_v58  ;;  %244 = vmatpush.msra.mxu0 %v538_v59  ;;  %v442_v58 = vld [vmem:[%s993_s7 + $0x18] sm:$0xff]  ;;  %v459_v59 = vld [vmem:[%s993_s7 + $0xa0] sm:$0xff] }
 0x120   :  { %501 = vmatpush.msrb.mxu2 %v460_v57 }
 0x121   :  { %271 = vmatpush.msrb.mxu1 %v215_v60  ;;  %245 = vmatpush.msra.mxu0 %v537_v61  ;;  %v441_v60 = vld [vmem:[%s993_s7 + $0x10] sm:$0xff]  ;;  %v458_v61 = vld [vmem:[%s993_s7 + $0x98] sm:$0xff] }
 0x122   :  { %502 = vmatpush.msrb.mxu2 %v459_v59 }
 0x123   :  { %547 = vmatpush.msk.msrb.mxu0 %vm226_vm2, %v546_v62  ;;  %550 = vmatpush.msk.msra.mxu1 %vm226_vm2, %v334_v3  ;;  %v440_v62 = vld [vmem:[%s993_s7 + $0x8] sm:$0xff] }
 0x124   :  { %543 = vmatmul.msk.f32.vlgmr.msrb.gmra.mxu1 %vm222_vm3, %v164_v53  ;;  %503 = vmatpush.msrb.mxu2 %v458_v61 }
 0x125   :  { %300 = vmatpush.msrb.mxu0 %v545_v63  ;;  %367 = vmatpush.msra.mxu1 %v330_v7  ;;  %v457_v63 = vld [vmem:[%s993_s7 + $0x90] sm:$0xff] }
 0x126   :  { %504 = vmatpush.msrb.mxu2 %v457_v63 }
 0x127   :  { %301 = vmatpush.msrb.mxu0 %v544_v0  ;;  %368 = vmatpush.msra.mxu1 %v326_v10  ;;  %v439_v0 = vld [vmem:[%s993_s7] sm:$0xff] }
 0x129   :  { %471 = vmatpush.msrb.mxu1 %v454_v21 }
 0x12b   :  { %472 = vmatpush.msrb.mxu1 %v453_v22 }
 0x12d   :  { %473 = vmatpush.msrb.mxu1 %v452_v25 }
 0x12f   :  { %474 = vmatpush.msrb.mxu1 %v451_v28 }
 0x131   :  { %475 = vmatpush.msrb.mxu1 %v450_v31 }
 0x133   :  { %476 = vmatpush.msrb.mxu1 %v449_v33 }
 0x135   :  { %477 = vmatpush.msrb.mxu1 %v448_v35 }
 0x137   :  { %478 = vmatpush.msrb.mxu1 %v447_v37 }
 0x139   :  { %479 = vmatpush.msrb.mxu1 %v446_v41 }
 0x13b   :  { %480 = vmatpush.msrb.mxu1 %v445_v44 }
 0x13d   :  { %481 = vmatpush.msrb.mxu1 %v444_v54 }
 0x13f   :  { %482 = vmatpush.msrb.mxu1 %v443_v56 }
 0x141   :  { %483 = vmatpush.msrb.mxu1 %v442_v58 }
 0x143   :  { %484 = vmatpush.msrb.mxu1 %v441_v60 }
 0x145   :  { %485 = vmatpush.msrb.mxu1 %v440_v62 }
 0x147   :  { %486 = vmatpush.msrb.mxu1 %v439_v0 }
 0x199   :  { %v188_v1 = vpop.f32.mrf.mxu0  ;;  %v212_v2 = vpop.f32.mrf.mxu1 }
 0x19a   :  { %541 = vmatmul.msk.f32.vlgmr.msra.gmra.mxu0 %vm222_vm3, %v188_v1  ;;  %v456_v1 = vld [vmem:[%s993_s7 + $0x88] sm:$0xff] }
 0x19b   :  { %552 = vmatpush.msk.msra.mxu0 %vm226_vm2, %v335_v4  ;;  %505 = vmatpush.msrb.mxu2 %v456_v1 }
 0x19d   :  { %387 = vmatpush.msra.mxu0 %v331_v8 }
 0x19f   :  { %388 = vmatpush.msra.mxu0 %v327_v11 }
 0x1a1   :  { %v273_v13 = vpop.f32.mrf.mxu1 }
 0x1a2   :  { %548 = vmatmul.msk.f32.vlgmr.msrb.gmra.mxu0 %vm222_vm3, %v212_v2  ;;  %v455_v2 = vld [vmem:[%s993_s7 + $0x80] sm:$0xff]  ;;  %s590_s7 = smov [#allocation2]  }
 0x1a3   :  { %556 = vmatpush.msk.msrb.mxu0 %vm226_vm2, %v337_v16  ;;  %506 = vmatpush.msrb.mxu2 %v455_v2  ;;  %s522_s5 = sshll.u32 %s590_s7, 4  ;;  %s523_s5 = int_to_ptr.vmem [resolvable:$true] %s522_s5 }
 0x1a5   :  { %427 = vmatpush.msrb.mxu0 %v333_v17 }
 0x1a7   :  { %428 = vmatpush.msrb.mxu0 %v329_v19 }
 0x217   :  { %v247_v6 = vpop.f32.mrf.mxu0 }
 0x218   :  { %v274_v14 = vadd.f32 %v273_v13, %v247_v6  ;;  %v559_v13 = vld [vmem:[%s994_s8] ss:$0 sm:$0xff] }
 0x21f   :  { %v303_v15 = vpop.f32.mrf.mxu0 }
 0x220   :  { %v306_v18 = vadd.f32 %v303_v15, %v274_v14 }
 0x222   :  { %v549_v20 = vmul.f32 -1.442695, %v306_v18 }
 0x224   :  { %560 = vpow2.f32 %v549_v20 }
 0x22a   :  { %v561_v27 = vpop.eup %560 }
 0x22b   :  { %v310_v30 = vadd.f32 1.0, %v561_v27 }
 0x22d   :  { %562 = vrcp.f32 %v310_v30  ;;  %v322_v45 = vand.u32 2147483648, %v310_v30  ;;  %v320_v47 = vand.u32 2147483647, %v310_v30  ;;  %vm316_vm5 = vweird.f32 %v310_v30 }
 0x22f   :  { %v323_v51 = vor.u32 1.1754944e-38, %v322_v45  ;;  %vm321_vm7 = vcmp.eq.f32.partialorder %v320_v47, 8.507059e+37 }
 0x233   :  { %v563_v39 = vpop.eup %562 }
 0x234   :  { %v312_v40 = vmul.f32 %v563_v39, %v310_v30  ;;  %vm317_vm4 = vweird.f32 %v563_v39 }
 0x235   :  { %vm318_vm6 = vmor %vm316_vm5, %vm317_vm4 }
 0x236   :  { %v313_v43 = vsub.f32 1.0, %v312_v40 }
 0x238   :  { %v314_v46 = vmul.f32 %v563_v39, %v313_v43 }
 0x23a   :  { %v315_v48 = vadd.f32 %v563_v39, %v314_v46 }
 0x23c   :  { %v319_v52 = vsel %vm318_vm6, %v563_v39, %v315_v48 }
 0x23d   :  { %v324_v53 = vsel %vm321_vm7, %v323_v51, %v319_v52 }
 0x23e   :  { %551 = vmatmul.msk.f32.vlgmr.msra.gmra.mxu1 %vm222_vm3, %v324_v53  ;;  %553 = vmatmul.msk.f32.vlgmr.msra.gmra.mxu0 %vm222_vm3, %v324_v53 }
 0x23f   :  { %555 = vmatmul.msk.f32.vlgmr.msra.gmra.mxu3 %vm222_vm3, %v324_v53 }
 0x246   :  { %557 = vmatmul.msk.f32.vlgmr.msrb.gmra.mxu0 %vm222_vm3, %v324_v53 }
 0x2bb   :  { %v390_v3 = vpop.f32.mrf.mxu0  ;;  %v370_v4 = vpop.f32.mrf.mxu1 }
 0x2bc   :  { %v433_v6 = vmul.f32 %v370_v4, %v790_v49  ;;  %v434_v9 = vmul.f32 %v390_v3, %v793_v50 }
 0x2c2   :  { %v410_v5 = vpop.f32.mrf.mxu3 }
 0x2c3   :  { %v435_v7 = vmul.f32 %v410_v5, %v793_v50  ;;  %v430_v8 = vpop.f32.mrf.mxu0 }
 0x2c4   :  { %v436_v10 = vmul.f32 %v430_v8, %v790_v49 }
 0x2c5   :  { %v437_v11 = vadd.f32 %v435_v7, %v433_v6 }
 0x2c6   :  { %v438_v12 = vadd.f32 %v436_v10, %v434_v9 }
 0x2c7   :  { %487 = vmatmul.f32.vlgmr.msrb.gmra.mxu1 %v437_v11 }
 0x2c8   :  { %507 = vmatmul.f32.vlgmr.msrb.gmra.mxu2 %v438_v12 }
 0x344   :  { %v488_v14 = vpop.f32.mrf.mxu1 }
 0x34b   :  { %v508_v15 = vpop.f32.mrf.mxu2 }
 0x34c   :  { %v509_v16 = vadd.f32 %v508_v15, %v488_v14 }
 0x34e   :  { %v515_v50 = vmul.f32 %v559_v13, %v509_v16 }
 0x350   :  { %516 = vst.msk [vmem:[#allocation2] sm:$0xff] %vm50_vm0, %v515_v50 }
 0x351   :  { %527 = dma.vmem_to_hbm [thread:$0]  %s523_s5, 128, %s525_s20, [#allocation3]  }
 0x352   :  { %588 = dma.done.wait [#allocation3], 128  }
 0x353   :  { %589 = vsyncadd [#allocation3], 4294967168 }
 0x354   :  { %532 = vsyncpa [#allocation3], 1 }

</bundles_post_ra>
